<compile_context>
chip_gen: v6e
topology: v6e:2x2x1
jax: 0.10.0
libtpu: 0.0.40
codegen_flags: <defaults>
</compile_context>

<pallas_src>
import jax
import jax.numpy as jnp
from jax.experimental import pallas as pl
from jax.experimental.pallas import tpu as pltpu

F_IN, F_HID, F_OUT = 250, 125, 25

# Fused single-call path used when the padded node count is small enough that
# A, X, W1/W2, and both intermediates comfortably fit in scoped VMEM on every
# TPU generation (v5e's 16 MiB default is the binding constraint).
_FUSE_MAX_NODES = 512


def _round_up(x, m):
    return ((x + m - 1) // m) * m


def _pick_tile(n_pad):
    for t in (512, 256, 128):
        if n_pad % t == 0:
            return t
    return 128


# ----------------------------------------------------------------------------
# Fused whole-forward kernel (small graphs): one pallas_call, grid=(1,)
# ----------------------------------------------------------------------------
def _gcn_fused_kernel(a_ref, x_ref, w1_ref, b1_ref, w2_ref, b2_ref, o_ref):
    a = a_ref[...]
    h = jnp.dot(x_ref[...], w1_ref[...], preferred_element_type=jnp.float32)
    h1 = jnp.maximum(
        jnp.dot(a, h, preferred_element_type=jnp.float32) + b1_ref[...], 0.0)
    h2 = jnp.dot(h1, w2_ref[...], preferred_element_type=jnp.float32)
    o_ref[...] = jnp.maximum(
        jnp.dot(a, h2, preferred_element_type=jnp.float32) + b2_ref[...], 0.0)


def gcn_fused(a, x, w1, b1, w2, b2):
    n_pad = a.shape[0]
    k1 = x.shape[1]
    c1 = w1.shape[1]
    c2 = w2.shape[1]

    def full(shape):
        return pl.BlockSpec(shape, lambda i, _n=len(shape): (0,) * _n)

    return pl.pallas_call(
        _gcn_fused_kernel,
        out_shape=jax.ShapeDtypeStruct((n_pad, c2), jnp.float32),
        grid=(1,),
        in_specs=[
            full((n_pad, n_pad)),   # A_norm
            full((n_pad, k1)),      # X
            full((k1, c1)),         # W1
            full((1, c1)),          # b1
            full((c1, c2)),         # W2
            full((1, c2)),          # b2
        ],
        out_specs=full((n_pad, c2)),
        compiler_params=pltpu.CompilerParams(
            dimension_semantics=("arbitrary",)),
    )(a, x, w1, b1, w2, b2)


# ----------------------------------------------------------------------------
# Per-layer fused kernel (fallback for large graphs):
#   Y = relu(A @ (X @ W) + b), rows "parallel", node contraction accumulated.
# ----------------------------------------------------------------------------
def _gcn_layer_kernel(a_ref, x_ref, w_ref, b_ref, o_ref, acc_ref):
    kk = pl.program_id(1)

    @pl.when(kk == 0)
    def _():
        acc_ref[...] = jnp.zeros_like(acc_ref)

    # W stays resident in VMEM (constant index_map); H tile is computed on the
    # fly so the dense H never round-trips through HBM.
    h = jnp.dot(x_ref[...], w_ref[...], preferred_element_type=jnp.float32)
    acc_ref[...] += jnp.dot(a_ref[...], h, preferred_element_type=jnp.float32)

    @pl.when(kk == pl.num_programs(1) - 1)
    def _():
        o_ref[...] = jnp.maximum(acc_ref[...] + b_ref[...], 0.0)


def gcn_layer(a, x, w, b, *, tm, tk):
    m = a.shape[0]
    kfeat = x.shape[1]
    n = w.shape[1]
    return pl.pallas_call(
        _gcn_layer_kernel,
        out_shape=jax.ShapeDtypeStruct((m, n), jnp.float32),
        grid=(m // tm, m // tk),
        in_specs=[
            pl.BlockSpec((tm, tk), lambda i, kk: (i, kk)),      # A tile
            pl.BlockSpec((tk, kfeat), lambda i, kk: (kk, 0)),   # X row block
            pl.BlockSpec((kfeat, n), lambda i, kk: (0, 0)),     # W (resident)
            pl.BlockSpec((1, n), lambda i, kk: (0, 0)),         # b (resident)
        ],
        out_specs=pl.BlockSpec((tm, n), lambda i, kk: (i, 0)),
        scratch_shapes=[pltpu.VMEM((tm, n), jnp.float32)],
        compiler_params=pltpu.CompilerParams(
            dimension_semantics=("parallel", "arbitrary")),
    )(a, x, w, b)


# ----------------------------------------------------------------------------
# JAX glue: normalized adjacency (self-loops + symmetric degree normalization),
# identical to torch_geometric's gcn_norm with default settings.
# ----------------------------------------------------------------------------
def build_norm_adj(edge_index, edge_weight, num_nodes, n_pad):
    row, col = edge_index[0], edge_index[1]          # source, target
    loop = jnp.arange(num_nodes, dtype=edge_index.dtype)
    row = jnp.concatenate([row, loop])               # add self-loops (weight 1)
    col = jnp.concatenate([col, loop])
    w = jnp.concatenate([edge_weight.astype(jnp.float32),
                         jnp.ones((num_nodes,), jnp.float32)])
    deg = jnp.zeros((num_nodes,), jnp.float32).at[col].add(w)
    d_inv_sqrt = jnp.where(deg > 0, jax.lax.rsqrt(deg), 0.0)
    norm = d_inv_sqrt[row] * w * d_inv_sqrt[col]
    # A[dst, src] = norm  so that out = A @ (X W) aggregates messages at dst.
    # Padded rows/cols stay zero, so padded nodes never contaminate valid rows.
    a = jnp.zeros((n_pad, n_pad), jnp.float32).at[col, row].add(norm)
    return a


# ----------------------------------------------------------------------------
# Parameter padding — done ONCE at init, outside the jitted hot path.
# ----------------------------------------------------------------------------
def pad_params(params):
    k1 = _round_up(F_IN, 128)        # 250 -> 256
    c1 = _round_up(F_HID, 128)       # 125 -> 128
    c2 = _round_up(F_OUT, 128)       # 25  -> 128
    return {
        "w1": jnp.zeros((k1, c1), jnp.float32).at[:F_IN, :F_HID].set(params["w1"]),
        "b1": jnp.zeros((1, c1), jnp.float32).at[0, :F_HID].set(params["b1"]),
        "w2": jnp.zeros((c1, c2), jnp.float32).at[:F_HID, :F_OUT].set(params["w2"]),
        "b2": jnp.zeros((1, c2), jnp.float32).at[0, :F_OUT].set(params["b2"]),
    }


# ----------------------------------------------------------------------------
# GCN forward:  x -> GCNConv(250,125) -> ReLU -> GCNConv(125,25) -> ReLU
# ----------------------------------------------------------------------------
@jax.jit
def gcn_forward(padded_params, x, edge_index, edge_attr):
    n, f_in = x.shape
    n_pad = _round_up(n, 128)
    k1 = padded_params["w1"].shape[0]

    a = build_norm_adj(edge_index, edge_attr, n, n_pad)
    x_pad = jnp.zeros((n_pad, k1), jnp.float32).at[:n, :f_in].set(x)

    if n_pad <= _FUSE_MAX_NODES:
        out = gcn_fused(a, x_pad,
                        padded_params["w1"], padded_params["b1"],
                        padded_params["w2"], padded_params["b2"])
    else:
        t = _pick_tile(n_pad)
        h1 = gcn_layer(a, x_pad, padded_params["w1"], padded_params["b1"],
                       tm=t, tk=t)
        out = gcn_layer(a, h1, padded_params["w2"], padded_params["b2"],
                        tm=t, tk=t)
    return out[:n, :F_OUT]


# TODO(synk): data.node_masks / data.edge_masks are unpacked by the PyTorch
# forward but never used, so they are constructed below and ignored.

if __name__ == "__main__":
    key = jax.random.PRNGKey(0)
    k_x, k_src, k_dst, k_w, k_p1, k_p2 = jax.random.split(key, 6)

    N, E = 64, 256

    x = jax.random.normal(k_x, (N, F_IN), jnp.float32)
    src = jax.random.randint(k_src, (E,), 0, N, dtype=jnp.int32)
    dst = jax.random.randint(k_dst, (E,), 0, N, dtype=jnp.int32)
    edge_index = jnp.stack([src, dst])                       # (2, E)
    edge_attr = jax.random.uniform(k_w, (E,), jnp.float32, 0.1, 1.0)
    node_masks = jnp.ones((N,), jnp.float32)                 # unused by forward
    edge_masks = jnp.ones((E,), jnp.float32)                 # unused by forward

    def glorot(k, shape):
        fan_in, fan_out = shape
        lim = (6.0 / (fan_in + fan_out)) ** 0.5
        return jax.random.uniform(k, shape, jnp.float32, -lim, lim)

    params = {
        "w1": glorot(k_p1, (F_IN, F_HID)),
        "b1": jnp.zeros((F_HID,), jnp.float32),   # GCNConv bias init = zeros
        "w2": glorot(k_p2, (F_HID, F_OUT)),
        "b2": jnp.zeros((F_OUT,), jnp.float32),
    }
    padded_params = pad_params(params)            # one-time, outside hot path

    out = gcn_forward(padded_params, x, edge_index, edge_attr)
    jax.block_until_ready(out)
    assert out.shape == (N, F_OUT)
    assert bool(jnp.all(out >= 0.0))   # ReLU applied
    print("KERNEL_OK")
</pallas_src>

<mosaic_0001>
module attributes {stable_mosaic.version = 11 : i64} {
  func.func private @main(%arg0: i32) attributes {dimension_semantics = [#tpu.dimension_semantics<core_parallel>], iteration_bounds = array<i64: 2>, tpu.core_type = #tpu.core_type<sc_scalar_subcore>, window_params = []} {
    return
  }
}

module attributes {stable_mosaic.version = 11 : i64} {
  func.func private @main(%arg0: i32) attributes {dimension_semantics = [#tpu.dimension_semantics<core_parallel>], iteration_bounds = array<i64: 2>, tpu.core_type = #tpu.core_type<sc_scalar_subcore>, window_params = []} {
    return
  }
}

module attributes {stable_mosaic.version = 11 : i64} {
  func.func @_gcn_fused_kernel(%arg0: i32, %arg1: memref<128x128xf32, #tpu.memory_space<vmem>>, %arg2: memref<128x256xf32, #tpu.memory_space<vmem>>, %arg3: memref<256x128xf32, #tpu.memory_space<vmem>>, %arg4: memref<1x128xf32, #tpu.memory_space<vmem>>, %arg5: memref<128x128xf32, #tpu.memory_space<vmem>>, %arg6: memref<1x128xf32, #tpu.memory_space<vmem>>, %arg7: memref<128x128xf32, #tpu.memory_space<vmem>>) attributes {dimension_semantics = [#tpu.dimension_semantics<arbitrary>], iteration_bounds = array<i64: 1>, scalar_prefetch = 0 : i64, scratch_operands = 0 : i64, tpu.core_type = #tpu.core_type<tc>, window_params = [{pipeline_mode = #tpu.pipeline_mode<synchronous>, transform_indices = @transform_0, window_bounds = array<i64: 128, 128>}, {pipeline_mode = #tpu.pipeline_mode<synchronous>, transform_indices = @transform_1, window_bounds = array<i64: 128, 256>}, {pipeline_mode = #tpu.pipeline_mode<synchronous>, transform_indices = @transform_2, window_bounds = array<i64: 256, 128>}, {pipeline_mode = #tpu.pipeline_mode<synchronous>, transform_indices = @transform_3, window_bounds = array<i64: 1, 128>}, {pipeline_mode = #tpu.pipeline_mode<synchronous>, transform_indices = @transform_4, window_bounds = array<i64: 128, 128>}, {pipeline_mode = #tpu.pipeline_mode<synchronous>, transform_indices = @transform_5, window_bounds = array<i64: 1, 128>}, {pipeline_mode = #tpu.pipeline_mode<synchronous>, transform_indices = @transform_6, window_bounds = array<i64: 128, 128>}]} {
    %c0 = arith.constant 0 : index
    %c0_0 = arith.constant 0 : index
    %0 = vector.load %arg1[%c0, %c0_0] : memref<128x128xf32, #tpu.memory_space<vmem>>, vector<128x128xf32>
    %c0_1 = arith.constant 0 : index
    %c0_2 = arith.constant 0 : index
    %1 = vector.load %arg2[%c0_1, %c0_2] : memref<128x256xf32, #tpu.memory_space<vmem>>, vector<128x256xf32>
    %c0_3 = arith.constant 0 : index
    %c0_4 = arith.constant 0 : index
    %2 = vector.load %arg3[%c0_3, %c0_4] : memref<256x128xf32, #tpu.memory_space<vmem>>, vector<256x128xf32>
    %cst = arith.constant dense<0.000000e+00> : vector<128x128xf32>
    %3 = tpu.matmul %1, %2, %cst {dimension_numbers = #tpu.dot_dimension_numbers<[1], [0], [0], [1], [0, 0, 1, 1], [], []>} : vector<128x256xf32>, vector<256x128xf32>, vector<128x128xf32> -> vector<128x128xf32>
    %cst_5 = arith.constant dense<0.000000e+00> : vector<128x128xf32>
    %4 = tpu.matmul %0, %3, %cst_5 {dimension_numbers = #tpu.dot_dimension_numbers<[1], [0], [0], [1], [0, 0, 1, 1], [], []>} : vector<128x128xf32>, vector<128x128xf32>, vector<128x128xf32> -> vector<128x128xf32>
    %c0_6 = arith.constant 0 : index
    %c0_7 = arith.constant 0 : index
    %5 = vector.load %arg4[%c0_6, %c0_7] : memref<1x128xf32, #tpu.memory_space<vmem>>, vector<1x128xf32>
    %6 = vector.broadcast %5 : vector<1x128xf32> to vector<128x128xf32>
    %7 = arith.addf %4, %6 : vector<128x128xf32>
    %cst_8 = arith.constant 0.000000e+00 : f32
    %8 = vector.broadcast %cst_8 : f32 to vector<128x128xf32>
    %9 = arith.maximumf %7, %8 : vector<128x128xf32>
    %c0_9 = arith.constant 0 : index
    %c0_10 = arith.constant 0 : index
    %10 = vector.load %arg5[%c0_9, %c0_10] : memref<128x128xf32, #tpu.memory_space<vmem>>, vector<128x128xf32>
    %cst_11 = arith.constant dense<0.000000e+00> : vector<128x128xf32>
    %11 = tpu.matmul %9, %10, %cst_11 {dimension_numbers = #tpu.dot_dimension_numbers<[1], [0], [0], [1], [0, 0, 1, 1], [], []>} : vector<128x128xf32>, vector<128x128xf32>, vector<128x128xf32> -> vector<128x128xf32>
    %cst_12 = arith.constant dense<0.000000e+00> : vector<128x128xf32>
    %12 = tpu.matmul %0, %11, %cst_12 {dimension_numbers = #tpu.dot_dimension_numbers<[1], [0], [0], [1], [0, 0, 1, 1], [], []>} : vector<128x128xf32>, vector<128x128xf32>, vector<128x128xf32> -> vector<128x128xf32>
    %c0_13 = arith.constant 0 : index
    %c0_14 = arith.constant 0 : index
    %13 = vector.load %arg6[%c0_13, %c0_14] : memref<1x128xf32, #tpu.memory_space<vmem>>, vector<1x128xf32>
    %14 = vector.broadcast %13 : vector<1x128xf32> to vector<128x128xf32>
    %15 = arith.addf %12, %14 : vector<128x128xf32>
    %cst_15 = arith.constant 0.000000e+00 : f32
    %16 = vector.broadcast %cst_15 : f32 to vector<128x128xf32>
    %17 = arith.maximumf %15, %16 : vector<128x128xf32>
    %c0_16 = arith.constant 0 : index
    %c0_17 = arith.constant 0 : index
    %18 = vector.load %arg7[%c0_16, %c0_17] : memref<128x128xf32, #tpu.memory_space<vmem>>, vector<128x128xf32>
    tpu.vector_store %arg7[%c0_16, %c0_17], %17 {strides = array<i32>} : memref<128x128xf32, #tpu.memory_space<vmem>>, vector<128x128xf32>,
    return
  }
  func.func @transform_0(%arg0: i32) -> (i32, i32) {
    %c0_i32 = arith.constant 0 : i32
    %c0_i32_0 = arith.constant 0 : i32
    %c0_i32_1 = arith.constant 0 : i32
    return %c0_i32, %c0_i32_0 : i32, i32
  }
  func.func @transform_1(%arg0: i32) -> (i32, i32) {
    %c0_i32 = arith.constant 0 : i32
    %c0_i32_0 = arith.constant 0 : i32
    %c0_i32_1 = arith.constant 0 : i32
    return %c0_i32, %c0_i32_0 : i32, i32
  }
  func.func @transform_2(%arg0: i32) -> (i32, i32) {
    %c0_i32 = arith.constant 0 : i32
    %c0_i32_0 = arith.constant 0 : i32
    %c0_i32_1 = arith.constant 0 : i32
    return %c0_i32, %c0_i32_0 : i32, i32
  }
  func.func @transform_3(%arg0: i32) -> (i32, i32) {
    %c0_i32 = arith.constant 0 : i32
    %c0_i32_0 = arith.constant 0 : i32
    %c0_i32_1 = arith.constant 0 : i32
    return %c0_i32, %c0_i32_0 : i32, i32
  }
  func.func @transform_4(%arg0: i32) -> (i32, i32) {
    %c0_i32 = arith.constant 0 : i32
    %c0_i32_0 = arith.constant 0 : i32
    %c0_i32_1 = arith.constant 0 : i32
    return %c0_i32, %c0_i32_0 : i32, i32
  }
  func.func @transform_5(%arg0: i32) -> (i32, i32) {
    %c0_i32 = arith.constant 0 : i32
    %c0_i32_0 = arith.constant 0 : i32
    %c0_i32_1 = arith.constant 0 : i32
    return %c0_i32, %c0_i32_0 : i32, i32
  }
  func.func @transform_6(%arg0: i32) -> (i32, i32) {
    %c0_i32 = arith.constant 0 : i32
    %c0_i32_0 = arith.constant 0 : i32
    %c0_i32_1 = arith.constant 0 : i32
    return %c0_i32, %c0_i32_0 : i32, i32
  }
}

</mosaic_0001>

<bundles_post_ra>
// kernel: gcn_forward.1
= control target key start
LH: loop header
LB: loop body
LE: loop exit
PB: predicated region body
PF: predicated region fallthrough
CT: control target
= control target key end

     0   :  { %11 = vsyncpa [#allocation3], 0  ;;  %s1183_s21 = smov [#allocation2]   ;;  %s1614_s0 = inlined_call_operand.hbm [shape: f32[128,128], index: 0, kind: input, shape index: {}]   ;;  %s1615_s1 = inlined_call_operand.vmem [shape: f32[128,256], index: 1, kind: input, shape index: {}]   ;;  %s1616_s2 = inlined_call_operand.vmem [shape: f32[256,128], index: 2, kind: input, shape index: {}]   ;;  %s1617_s3 = inlined_call_operand.vmem [shape: f32[1,128], index: 3, kind: input, shape index: {}]   ;;  %s1618_s4 = inlined_call_operand.vmem [shape: f32[128,128], index: 4, kind: input, shape index: {}]   ;;  %s1619_s5 = inlined_call_operand.vmem [shape: f32[1,128], index: 5, kind: input, shape index: {}]   ;;  %s1620_s6 = inlined_call_operand.vmem [shape: f32[128,128], index: 6, kind: output, shape index: {}]  }
   0x1   :  { %s17_s22 = sshll.u32 %s1183_s21, 4  ;;  %s18_s22 = int_to_ptr.vmem [resolvable:$true] %s17_s22 }
   0x2   :  { %s1169_s23 = scalar_lea.vmem %s18_s22, 2048  ;;  %p1174_p1 = scmp.lt.s32.totalorder %s18_s22, %s18_s22 }
   0x3   :  { %p1170_p0 = scmp.ne.s32.totalorder %s18_s22, %s1169_s23  ;;  %p1175_p2 = scmp.lt.s32.totalorder %s1169_s23, %s1169_s23 }
   0x5   :  { %p1176_p3 = por %p1175_p2, %p1174_p1 }
   0x7   :  { %p1177_p4 = pnand %p1176_p3, %p1170_p0 }
   0x9   :  { %1180 = shalt.err (!%p1177_p4)
}
   0xa   :  { %s1184_s24 = smov 128   ;;  %s1185_s25 = smov 8  }
   0xb   :  { %23 = dma.hbm_to_vmem [thread:$0]  %s1614_s0, 2048, %s18_s22, [#allocation3], %s1184_s24, %s1184_s24, %s1185_s25  }
   0xc   :  { %1181 = dma.done.wait [#allocation3], 2048  }
   0xd   :  { %1182 = vsyncadd [#allocation3], 4294965248  ;;  %v116_v0 = vld [vmem:[%s1616_s2 + $0xf8] sm:$0xff]  ;;  %v115_v2 = vld [vmem:[%s1616_s2 + $0xf0] sm:$0xff] }
   0xe   :  { %v100_v1 = vld [vmem:[%s1616_s2 + $0x78] sm:$0xff]  ;;  %782 = vmatprep.subr.mxu0 %v116_v0  ;;  %v99_v3 = vld [vmem:[%s1616_s2 + $0x70] sm:$0xff]  ;;  %v114_v4 = vld [vmem:[%s1616_s2 + $0xe8] sm:$0xff] }
   0xf   :  { %783 = vmatpush3.msra.mxu0 %v100_v1  ;;  %v98_v5 = vld [vmem:[%s1616_s2 + $0x68] sm:$0xff]  ;;  %v113_v6 = vld [vmem:[%s1616_s2 + $0xe0] sm:$0xff]  ;;  %v112_v8 = vld [vmem:[%s1616_s2 + $0xd8] sm:$0xff] }
  0x10   :  { %784 = vmatprep.subr.mxu0 %v115_v2  ;;  %v97_v7 = vld [vmem:[%s1616_s2 + $0x60] sm:$0xff]  ;;  %v96_v9 = vld [vmem:[%s1616_s2 + $0x58] sm:$0xff]  ;;  %v111_v10 = vld [vmem:[%s1616_s2 + $0xd0] sm:$0xff] }
  0x11   :  { %785 = vmatpush3.msra.mxu0 %v99_v3  ;;  %v95_v11 = vld [vmem:[%s1616_s2 + $0x50] sm:$0xff]  ;;  %v110_v12 = vld [vmem:[%s1616_s2 + $0xc8] sm:$0xff]  ;;  %v109_v15 = vld [vmem:[%s1616_s2 + $0xc0] sm:$0xff] }
  0x12   :  { %786 = vmatprep.subr.mxu0 %v114_v4  ;;  %v54_v13 = vld [vmem:[%s1615_s1 + $0x8] sm:$0xff]  ;;  %v93_v16 = vld [vmem:[%s1616_s2 + $0x40] sm:$0xff]  ;;  %v108_v17 = vld [vmem:[%s1616_s2 + $0xb8] sm:$0xff] }
  0x13   :  { %787 = vmatpush3.msra.mxu0 %v98_v5  ;;  %v94_v14 = vld [vmem:[%s1616_s2 + $0x48] sm:$0xff]  ;;  %181 = vmatprep.mubr.f32.mxu0 %v54_v13  ;;  %v92_v18 = vld [vmem:[%s1616_s2 + $0x38] sm:$0xff]  ;;  %v107_v19 = vld [vmem:[%s1616_s2 + $0xb0] sm:$0xff] }
  0x14   :  { %788 = vmatprep.subr.mxu0 %v113_v6  ;;  %v91_v20 = vld [vmem:[%s1616_s2 + $0x30] sm:$0xff]  ;;  %v106_v21 = vld [vmem:[%s1616_s2 + $0xa8] sm:$0xff]  ;;  %v105_v23 = vld [vmem:[%s1616_s2 + $0xa0] sm:$0xff] }
  0x15   :  { %789 = vmatpush3.msra.mxu0 %v97_v7  ;;  %v90_v22 = vld [vmem:[%s1616_s2 + $0x28] sm:$0xff]  ;;  %v89_v24 = vld [vmem:[%s1616_s2 + $0x20] sm:$0xff]  ;;  %v104_v25 = vld [vmem:[%s1616_s2 + $0x98] sm:$0xff] }
  0x16   :  { %790 = vmatprep.subr.mxu0 %v112_v8  ;;  %v88_v26 = vld [vmem:[%s1616_s2 + $0x18] sm:$0xff]  ;;  %v103_v27 = vld [vmem:[%s1616_s2 + $0x90] sm:$0xff]  ;;  %v102_v29 = vld [vmem:[%s1616_s2 + $0x88] sm:$0xff] }
  0x17   :  { %791 = vmatpush3.msra.mxu0 %v96_v9  ;;  %v87_v28 = vld [vmem:[%s1616_s2 + $0x10] sm:$0xff]  ;;  %v86_v30 = vld [vmem:[%s1616_s2 + $0x8] sm:$0xff]  ;;  %v101_v31 = vld [vmem:[%s1616_s2 + $0x80] sm:$0xff] }
  0x18   :  { %792 = vmatprep.subr.mxu0 %v111_v10  ;;  %v85_v32 = vld [vmem:[%s1616_s2] sm:$0xff]  ;;  %v56_v34 = vld [vmem:[%s1615_s1 + $0x18] sm:$0xff]  ;;  %v55_v35 = vld [vmem:[%s1615_s1 + $0x10] sm:$0xff] }
  0x19   :  { %793 = vmatpush3.msra.mxu0 %v95_v11  ;;  %v53_v33 = vld [vmem:[%s1615_s1] sm:$0xff]  ;;  %v58_v36 = vld [vmem:[%s1615_s1 + $0x28] sm:$0xff]  ;;  %v60_v38 = vld [vmem:[%s1615_s1 + $0x38] sm:$0xff] }
  0x1a   :  { %794 = vmatprep.subr.mxu0 %v110_v12  ;;  %v57_v37 = vld [vmem:[%s1615_s1 + $0x20] sm:$0xff]  ;;  %v59_v39 = vld [vmem:[%s1615_s1 + $0x30] sm:$0xff]  ;;  %v62_v40 = vld [vmem:[%s1615_s1 + $0x48] sm:$0xff] }
  0x1b   :  { %795 = vmatpush3.msra.mxu0 %v94_v14  ;;  %v61_v41 = vld [vmem:[%s1615_s1 + $0x40] sm:$0xff]  ;;  %v64_v42 = vld [vmem:[%s1615_s1 + $0x58] sm:$0xff]  ;;  %v63_v43 = vld [vmem:[%s1615_s1 + $0x50] sm:$0xff] }
  0x1c   :  { %796 = vmatprep.subr.mxu0 %v109_v15  ;;  %v66_v44 = vld [vmem:[%s1615_s1 + $0x68] sm:$0xff]  ;;  %v65_v45 = vld [vmem:[%s1615_s1 + $0x60] sm:$0xff]  ;;  %v68_v46 = vld [vmem:[%s1615_s1 + $0x78] sm:$0xff] }
  0x1d   :  { %797 = vmatpush3.msra.mxu0 %v93_v16  ;;  %v67_v47 = vld [vmem:[%s1615_s1 + $0x70] sm:$0xff]  ;;  %v70_v48 = vld [vmem:[%s1615_s1 + $0x88] sm:$0xff]  ;;  %v69_v49 = vld [vmem:[%s1615_s1 + $0x80] sm:$0xff] }
  0x1e   :  { %798 = vmatprep.subr.mxu0 %v108_v17  ;;  %v72_v50 = vld [vmem:[%s1615_s1 + $0x98] sm:$0xff]  ;;  %v71_v51 = vld [vmem:[%s1615_s1 + $0x90] sm:$0xff]  ;;  %v74_v52 = vld [vmem:[%s1615_s1 + $0xa8] sm:$0xff] }
  0x1f   :  { %799 = vmatpush3.msra.mxu0 %v92_v18  ;;  %v73_v53 = vld [vmem:[%s1615_s1 + $0xa0] sm:$0xff]  ;;  %v76_v54 = vld [vmem:[%s1615_s1 + $0xb8] sm:$0xff]  ;;  %v75_v55 = vld [vmem:[%s1615_s1 + $0xb0] sm:$0xff] }
  0x20   :  { %800 = vmatprep.subr.mxu0 %v107_v19  ;;  %v78_v56 = vld [vmem:[%s1615_s1 + $0xc8] sm:$0xff]  ;;  %v77_v57 = vld [vmem:[%s1615_s1 + $0xc0] sm:$0xff]  ;;  %v80_v58 = vld [vmem:[%s1615_s1 + $0xd8] sm:$0xff] }
  0x21   :  { %801 = vmatpush3.msra.mxu0 %v91_v20  ;;  %v79_v59 = vld [vmem:[%s1615_s1 + $0xd0] sm:$0xff]  ;;  %v82_v60 = vld [vmem:[%s1615_s1 + $0xe8] sm:$0xff]  ;;  %v81_v61 = vld [vmem:[%s1615_s1 + $0xe0] sm:$0xff] }
  0x22   :  { %802 = vmatprep.subr.mxu0 %v106_v21  ;;  %v84_v62 = vld [vmem:[%s1615_s1 + $0xf8] sm:$0xff]  ;;  %v83_v63 = vld [vmem:[%s1615_s1 + $0xf0] sm:$0xff]  ;;  %v37_v0 = vld [vmem:[#allocation2] sm:$0xff] }
  0x23   :  { %803 = vmatpush3.msra.mxu0 %v90_v22  ;;  %990 = vmatprep.mubr.f32.mxu1 %v37_v0 }
  0x24   :  { %804 = vmatprep.subr.mxu0 %v105_v23 }
  0x25   :  { %805 = vmatpush3.msra.mxu0 %v89_v24 }
  0x26   :  { %806 = vmatprep.subr.mxu0 %v104_v25 }
  0x27   :  { %807 = vmatpush3.msra.mxu0 %v88_v26 }
  0x28   :  { %808 = vmatprep.subr.mxu0 %v103_v27 }
  0x29   :  { %809 = vmatpush3.msra.mxu0 %v87_v28 }
  0x2a   :  { %810 = vmatprep.subr.mxu0 %v102_v29 }
  0x2b   :  { %811 = vmatpush3.msra.mxu0 %v86_v30 }
  0x2c   :  { %812 = vmatprep.subr.mxu0 %v101_v31 }
  0x2d   :  { %813 = vmatpush3.msra.mxu0 %v85_v32 }
  0x2e   :  { %182 = vmatmul.mubr.f32.vlgmr.msra.gmra.mxu0 %v53_v33 }
  0x2f   :  { %186 = vmatprep.mubr.f32.mxu0 %v56_v34 }
  0x32   :  { %187 = vmatmul.mubr.f32.gmra.mxu0 %v55_v35 }
  0x33   :  { %191 = vmatprep.mubr.f32.mxu0 %v58_v36 }
  0x36   :  { %192 = vmatmul.mubr.f32.gmra.mxu0 %v57_v37 }
  0x37   :  { %196 = vmatprep.mubr.f32.mxu0 %v60_v38 }
  0x3a   :  { %197 = vmatmul.mubr.f32.gmra.mxu0 %v59_v39 }
  0x3b   :  { %201 = vmatprep.mubr.f32.mxu0 %v62_v40 }
  0x3e   :  { %202 = vmatmul.mubr.f32.gmra.mxu0 %v61_v41 }
  0x3f   :  { %206 = vmatprep.mubr.f32.mxu0 %v64_v42 }
  0x42   :  { %207 = vmatmul.mubr.f32.gmra.mxu0 %v63_v43 }
  0x43   :  { %211 = vmatprep.mubr.f32.mxu0 %v66_v44 }
  0x46   :  { %212 = vmatmul.mubr.f32.gmra.mxu0 %v65_v45 }
  0x47   :  { %216 = vmatprep.mubr.f32.mxu0 %v68_v46 }
  0x4a   :  { %217 = vmatmul.mubr.f32.gmra.mxu0 %v67_v47 }
  0x4b   :  { %221 = vmatprep.mubr.f32.mxu0 %v70_v48 }
  0x4e   :  { %222 = vmatmul.mubr.f32.gmra.mxu0 %v69_v49  ;;  %v1426_v49 = vld [vmem:[#allocation2 + $0x8] sm:$0xff] }
  0x4f   :  { %226 = vmatprep.mubr.f32.mxu0 %v72_v50  ;;  %v445_v50 = vld [vmem:[%s1618_s4 + $0x78] sm:$0xff] }
  0x52   :  { %227 = vmatmul.mubr.f32.gmra.mxu0 %v71_v51  ;;  %v1432_v51 = vld [vmem:[#allocation2 + $0x10] sm:$0xff] }
  0x53   :  { %231 = vmatprep.mubr.f32.mxu0 %v74_v52  ;;  %v444_v52 = vld [vmem:[%s1618_s4 + $0x70] sm:$0xff] }
  0x56   :  { %232 = vmatmul.mubr.f32.gmra.mxu0 %v73_v53  ;;  %v1440_v53 = vld [vmem:[#allocation2 + $0x18] sm:$0xff] }
  0x57   :  { %236 = vmatprep.mubr.f32.mxu0 %v76_v54  ;;  %v443_v54 = vld [vmem:[%s1618_s4 + $0x68] sm:$0xff] }
  0x5a   :  { %237 = vmatmul.mubr.f32.gmra.mxu0 %v75_v55  ;;  %v1445_v55 = vld [vmem:[#allocation2 + $0x20] sm:$0xff] }
  0x5b   :  { %241 = vmatprep.mubr.f32.mxu0 %v78_v56  ;;  %v442_v56 = vld [vmem:[%s1618_s4 + $0x60] sm:$0xff] }
  0x5e   :  { %242 = vmatmul.mubr.f32.gmra.mxu0 %v77_v57  ;;  %v1452_v57 = vld [vmem:[#allocation2 + $0x28] sm:$0xff] }
  0x5f   :  { %246 = vmatprep.mubr.f32.mxu0 %v80_v58  ;;  %v441_v58 = vld [vmem:[%s1618_s4 + $0x58] sm:$0xff] }
  0x62   :  { %247 = vmatmul.mubr.f32.gmra.mxu0 %v79_v59  ;;  %v1457_v59 = vld [vmem:[#allocation2 + $0x30] sm:$0xff] }
  0x63   :  { %251 = vmatprep.mubr.f32.mxu0 %v82_v60  ;;  %v440_v60 = vld [vmem:[%s1618_s4 + $0x50] sm:$0xff] }
  0x66   :  { %252 = vmatmul.mubr.f32.gmra.mxu0 %v81_v61  ;;  %v1464_v61 = vld [vmem:[#allocation2 + $0x38] sm:$0xff] }
  0x67   :  { %256 = vmatprep.mubr.f32.mxu0 %v84_v62  ;;  %v439_v62 = vld [vmem:[%s1618_s4 + $0x48] sm:$0xff] }
  0x6a   :  { %257 = vmatmul.mubr.f32.gmra.mxu0 %v83_v63  ;;  %v1469_v63 = vld [vmem:[#allocation2 + $0x40] sm:$0xff] }
  0x6b   :  { %1102 = vmatprep.mubr.f32.mxu0 %v37_v0  ;;  %v438_v0 = vld [vmem:[%s1618_s4 + $0x40] sm:$0xff] }
  0xee   :  { %v814_v1 = vpop.f32.mrf.mxu0 }
  0xf0   :  { %v815_v2 = vpop.f32.mrf.mxu0 }
  0xf1   :  { %v1416_v3 = vadd.f32 %v815_v2, %v814_v1  ;;  %v1476_v1 = vld [vmem:[#allocation2 + $0x48] sm:$0xff]  ;;  %v437_v2 = vld [vmem:[%s1618_s4 + $0x38] sm:$0xff] }
  0xf2   :  { %v817_v4 = vpop.f32.mrf.mxu0 }
  0xf4   :  { %v818_v5 = vpop.f32.mrf.mxu0 }
  0xf5   :  { %v1418_v6 = vadd.f32 %v818_v5, %v817_v4  ;;  %v436_v4 = vld [vmem:[%s1618_s4 + $0x30] sm:$0xff]  ;;  %v1488_v5 = vld [vmem:[#allocation2 + $0x58] sm:$0xff] }
  0xf6   :  { %v820_v7 = vpop.f32.mrf.mxu0 }
  0xf8   :  { %v821_v8 = vpop.f32.mrf.mxu0 }
  0xf9   :  { %v1420_v9 = vadd.f32 %v821_v8, %v820_v7  ;;  %v1493_v7 = vld [vmem:[#allocation2 + $0x60] sm:$0xff] }
  0xfa   :  { %v823_v10 = vpop.f32.mrf.mxu0  ;;  %v434_v8 = vld [vmem:[%s1618_s4 + $0x20] sm:$0xff] }
  0xfc   :  { %v824_v11 = vpop.f32.mrf.mxu0 }
  0xfd   :  { %v825_v12 = vadd.f32 %v824_v11, %v823_v10  ;;  %v1502_v10 = vld [vmem:[#allocation2 + $0x70] sm:$0xff]  ;;  %v1506_v11 = vld [vmem:[#allocation2 + $0x78] sm:$0xff] }
  0xfe   :  { %v826_v13 = vpop.f32.mrf.mxu0 }
 0x100   :  { %v827_v14 = vpop.f32.mrf.mxu0 }
 0x101   :  { %v828_v15 = vadd.f32 %v827_v14, %v826_v13  ;;  %v432_v13 = vld [vmem:[%s1618_s4 + $0x10] sm:$0xff]  ;;  %v431_v14 = vld [vmem:[%s1618_s4 + $0x8] sm:$0xff] }
 0x102   :  { %v829_v16 = vpop.f32.mrf.mxu0 }
 0x104   :  { %v830_v17 = vpop.f32.mrf.mxu0 }
 0x105   :  { %v831_v48 = vadd.f32 %v830_v17, %v829_v16  ;;  %v780_v16 = vld [vmem:[%s1617_s3] ss:$0 sm:$0xff] }
 0x106   :  { %v832_v18 = vpop.f32.mrf.mxu0 }
 0x108   :  { %v833_v19 = vpop.f32.mrf.mxu0 }
 0x109   :  { %v834_v47 = vadd.f32 %v833_v19, %v832_v18 }
 0x10a   :  { %v835_v20 = vpop.f32.mrf.mxu0 }
 0x10c   :  { %v836_v21 = vpop.f32.mrf.mxu0 }
 0x10d   :  { %v837_v46 = vadd.f32 %v836_v21, %v835_v20 }
 0x10e   :  { %v838_v22 = vpop.f32.mrf.mxu0 }
 0x110   :  { %v839_v23 = vpop.f32.mrf.mxu0 }
 0x111   :  { %v840_v45 = vadd.f32 %v839_v23, %v838_v22 }
 0x112   :  { %v841_v24 = vpop.f32.mrf.mxu0 }
 0x114   :  { %v842_v25 = vpop.f32.mrf.mxu0 }
 0x115   :  { %v843_v44 = vadd.f32 %v842_v25, %v841_v24 }
 0x116   :  { %v844_v26 = vpop.f32.mrf.mxu0 }
 0x118   :  { %v845_v27 = vpop.f32.mrf.mxu0 }
 0x119   :  { %v846_v43 = vadd.f32 %v845_v27, %v844_v26 }
 0x11a   :  { %v847_v28 = vpop.f32.mrf.mxu0 }
 0x11c   :  { %v848_v29 = vpop.f32.mrf.mxu0 }
 0x11d   :  { %v849_v42 = vadd.f32 %v848_v29, %v847_v28 }
 0x11e   :  { %v850_v30 = vpop.f32.mrf.mxu0 }
 0x120   :  { %v851_v31 = vpop.f32.mrf.mxu0 }
 0x121   :  { %v852_v41 = vadd.f32 %v851_v31, %v850_v30 }
 0x122   :  { %v853_v32 = vpop.f32.mrf.mxu0 }
 0x124   :  { %v854_v33 = vpop.f32.mrf.mxu0 }
 0x125   :  { %v855_v40 = vadd.f32 %v854_v33, %v853_v32 }
 0x126   :  { %v856_v34 = vpop.f32.mrf.mxu0 }
 0x128   :  { %v857_v35 = vpop.f32.mrf.mxu0 }
 0x129   :  { %v858_v39 = vadd.f32 %v857_v35, %v856_v34 }
 0x12a   :  { %v859_v36 = vpop.f32.mrf.mxu0 }
 0x12c   :  { %v860_v37 = vpop.f32.mrf.mxu0 }
 0x12d   :  { %v861_v38 = vadd.f32 %v860_v37, %v859_v36 }
 0x12f   :  { %958 = vmatprep.subr.mxu1 %v861_v38 }
 0x130   :  { %959 = vmatpush3.msra.mxu1 %v861_v38 }
 0x131   :  { %960 = vmatprep.subr.mxu1 %v858_v39 }
 0x132   :  { %961 = vmatpush3.msra.mxu1 %v858_v39 }
 0x133   :  { %962 = vmatprep.subr.mxu1 %v855_v40 }
 0x134   :  { %963 = vmatpush3.msra.mxu1 %v855_v40 }
 0x135   :  { %964 = vmatprep.subr.mxu1 %v852_v41 }
 0x136   :  { %965 = vmatpush3.msra.mxu1 %v852_v41 }
 0x137   :  { %966 = vmatprep.subr.mxu1 %v849_v42 }
 0x138   :  { %967 = vmatpush3.msra.mxu1 %v849_v42 }
 0x139   :  { %968 = vmatprep.subr.mxu1 %v846_v43 }
 0x13a   :  { %969 = vmatpush3.msra.mxu1 %v846_v43 }
 0x13b   :  { %970 = vmatprep.subr.mxu1 %v843_v44 }
 0x13c   :  { %971 = vmatpush3.msra.mxu1 %v843_v44 }
 0x13d   :  { %972 = vmatprep.subr.mxu1 %v840_v45 }
 0x13e   :  { %973 = vmatpush3.msra.mxu1 %v840_v45 }
 0x13f   :  { %974 = vmatprep.subr.mxu1 %v837_v46 }
 0x140   :  { %975 = vmatpush3.msra.mxu1 %v837_v46 }
 0x141   :  { %976 = vmatprep.subr.mxu1 %v834_v47 }
 0x142   :  { %977 = vmatpush3.msra.mxu1 %v834_v47 }
 0x143   :  { %978 = vmatprep.subr.mxu1 %v831_v48 }
 0x144   :  { %979 = vmatpush3.msra.mxu1 %v831_v48 }
 0x145   :  { %980 = vmatprep.subr.mxu1 %v828_v15 }
 0x146   :  { %981 = vmatpush3.msra.mxu1 %v828_v15  ;;  %v430_v15 = vld [vmem:[%s1618_s4] sm:$0xff] }
 0x147   :  { %982 = vmatprep.subr.mxu1 %v825_v12 }
 0x148   :  { %983 = vmatpush3.msra.mxu1 %v825_v12  ;;  %v433_v12 = vld [vmem:[%s1618_s4 + $0x18] sm:$0xff] }
 0x149   :  { %984 = vmatprep.subr.mxu1 %v1420_v9 }
 0x14a   :  { %985 = vmatpush3.msra.mxu1 %v1420_v9  ;;  %v1500_v9 = vld [vmem:[#allocation2 + $0x68] sm:$0xff] }
 0x14b   :  { %986 = vmatprep.subr.mxu1 %v1418_v6 }
 0x14c   :  { %987 = vmatpush3.msra.mxu1 %v1418_v6  ;;  %v435_v6 = vld [vmem:[%s1618_s4 + $0x28] sm:$0xff] }
 0x14d   :  { %988 = vmatprep.subr.mxu1 %v1416_v3 }
 0x14e   :  { %989 = vmatpush3.msra.mxu1 %v1416_v3  ;;  %v1481_v3 = vld [vmem:[#allocation2 + $0x50] sm:$0xff] }
 0x14f   :  { %991 = vmatmul.mubr.f32.vlgmr.msra.gmra.mxu1 %v1426_v49  ;;  %1014 = vmatprep.subr.mxu1 %v445_v50 }
 0x150   :  { %993 = vmatprep.mubr.f32.mxu1 %v1432_v51  ;;  %1015 = vmatpush3.msra.mxu1 %v445_v50 }
 0x151   :  { %1016 = vmatprep.subr.mxu1 %v444_v52 }
 0x152   :  { %1017 = vmatpush3.msra.mxu1 %v444_v52 }
 0x153   :  { %994 = vmatmul.mubr.f32.gmra.mxu1 %v1440_v53  ;;  %1018 = vmatprep.subr.mxu1 %v443_v54 }
 0x154   :  { %996 = vmatprep.mubr.f32.mxu1 %v1445_v55  ;;  %1019 = vmatpush3.msra.mxu1 %v443_v54 }
 0x155   :  { %1020 = vmatprep.subr.mxu1 %v442_v56 }
 0x156   :  { %1021 = vmatpush3.msra.mxu1 %v442_v56 }
 0x157   :  { %997 = vmatmul.mubr.f32.gmra.mxu1 %v1452_v57  ;;  %1022 = vmatprep.subr.mxu1 %v441_v58 }
 0x158   :  { %999 = vmatprep.mubr.f32.mxu1 %v1457_v59  ;;  %1023 = vmatpush3.msra.mxu1 %v441_v58 }
 0x159   :  { %1024 = vmatprep.subr.mxu1 %v440_v60 }
 0x15a   :  { %1025 = vmatpush3.msra.mxu1 %v440_v60 }
 0x15b   :  { %1000 = vmatmul.mubr.f32.gmra.mxu1 %v1464_v61  ;;  %1026 = vmatprep.subr.mxu1 %v439_v62 }
 0x15c   :  { %1002 = vmatprep.mubr.f32.mxu1 %v1469_v63  ;;  %1027 = vmatpush3.msra.mxu1 %v439_v62 }
 0x15d   :  { %1028 = vmatprep.subr.mxu1 %v438_v0 }
 0x15e   :  { %1029 = vmatpush3.msra.mxu1 %v438_v0 }
 0x15f   :  { %1003 = vmatmul.mubr.f32.gmra.mxu1 %v1476_v1  ;;  %1030 = vmatprep.subr.mxu1 %v437_v2 }
 0x160   :  { %1005 = vmatprep.mubr.f32.mxu1 %v1481_v3  ;;  %1031 = vmatpush3.msra.mxu1 %v437_v2 }
 0x161   :  { %1032 = vmatprep.subr.mxu1 %v436_v4 }
 0x162   :  { %1033 = vmatpush3.msra.mxu1 %v436_v4 }
 0x163   :  { %1006 = vmatmul.mubr.f32.gmra.mxu1 %v1488_v5  ;;  %1034 = vmatprep.subr.mxu1 %v435_v6 }
 0x164   :  { %1008 = vmatprep.mubr.f32.mxu1 %v1493_v7  ;;  %1035 = vmatpush3.msra.mxu1 %v435_v6 }
 0x165   :  { %1036 = vmatprep.subr.mxu1 %v434_v8 }
 0x166   :  { %1037 = vmatpush3.msra.mxu1 %v434_v8 }
 0x167   :  { %1009 = vmatmul.mubr.f32.gmra.mxu1 %v1500_v9  ;;  %1038 = vmatprep.subr.mxu1 %v433_v12 }
 0x168   :  { %1011 = vmatprep.mubr.f32.mxu1 %v1502_v10  ;;  %1039 = vmatpush3.msra.mxu1 %v433_v12 }
 0x169   :  { %1040 = vmatprep.subr.mxu1 %v432_v13 }
 0x16a   :  { %1041 = vmatpush3.msra.mxu1 %v432_v13 }
 0x16b   :  { %1012 = vmatmul.mubr.f32.gmra.mxu1 %v1506_v11  ;;  %1042 = vmatprep.subr.mxu1 %v431_v14 }
 0x16c   :  { %1043 = vmatpush3.msra.mxu1 %v431_v14 }
 0x16d   :  { %1044 = vmatprep.subr.mxu1 %v430_v15 }
 0x16e   :  { %1045 = vmatpush3.msra.mxu1 %v430_v15 }
 0x20f   :  { %v992_v17 = vpop.f32.mrf.mxu1 }
 0x210   :  { %v341_v18 = vadd.f32 %v992_v17, %v780_v16 }
 0x211   :  { %v335_v19 = vpop.f32.mrf.mxu1 }
 0x212   :  { %v336_v20 = vadd.f32 %v780_v16, %v335_v19  ;;  %v415_v23 = vmax.f32 %v341_v18, 0.0 }
 0x213   :  { %v995_v21 = vpop.f32.mrf.mxu1 }
 0x214   :  { %v414_v22 = vmax.f32 %v336_v20, 0.0  ;;  %v351_v24 = vadd.f32 %v995_v21, %v780_v16 }
 0x215   :  { %v345_v25 = vpop.f32.mrf.mxu1 }
 0x216   :  { %v346_v26 = vadd.f32 %v780_v16, %v345_v25  ;;  %1046 = vmatprep.mubr.f32.mxu1 %v414_v22  ;;  %v417_v29 = vmax.f32 %v351_v24, 0.0 }
 0x217   :  { %v998_v27 = vpop.f32.mrf.mxu1  ;;  %1047 = vmatmul.mubr.f32.vlgmr.msra.gmra.mxu1 %v415_v23 }
 0x218   :  { %v416_v28 = vmax.f32 %v346_v26, 0.0  ;;  %v361_v30 = vadd.f32 %v998_v27, %v780_v16 }
 0x219   :  { %v355_v31 = vpop.f32.mrf.mxu1 }
 0x21a   :  { %v356_v32 = vadd.f32 %v780_v16, %v355_v31  ;;  %1049 = vmatprep.mubr.f32.mxu1 %v416_v28  ;;  %v419_v35 = vmax.f32 %v361_v30, 0.0 }
 0x21b   :  { %v1001_v33 = vpop.f32.mrf.mxu1  ;;  %1050 = vmatmul.mubr.f32.gmra.mxu1 %v417_v29 }
 0x21c   :  { %v418_v34 = vmax.f32 %v356_v32, 0.0  ;;  %v371_v36 = vadd.f32 %v1001_v33, %v780_v16 }
 0x21d   :  { %v365_v37 = vpop.f32.mrf.mxu1 }
 0x21e   :  { %v366_v38 = vadd.f32 %v780_v16, %v365_v37  ;;  %1052 = vmatprep.mubr.f32.mxu1 %v418_v34  ;;  %v421_v41 = vmax.f32 %v371_v36, 0.0 }
 0x21f   :  { %v1004_v39 = vpop.f32.mrf.mxu1  ;;  %1053 = vmatmul.mubr.f32.gmra.mxu1 %v419_v35 }
 0x220   :  { %v420_v40 = vmax.f32 %v366_v38, 0.0  ;;  %v381_v42 = vadd.f32 %v1004_v39, %v780_v16 }
 0x221   :  { %v375_v43 = vpop.f32.mrf.mxu1 }
 0x222   :  { %v376_v44 = vadd.f32 %v780_v16, %v375_v43  ;;  %1055 = vmatprep.mubr.f32.mxu1 %v420_v40  ;;  %v423_v47 = vmax.f32 %v381_v42, 0.0 }
 0x223   :  { %v1007_v45 = vpop.f32.mrf.mxu1  ;;  %1056 = vmatmul.mubr.f32.gmra.mxu1 %v421_v41 }
 0x224   :  { %v422_v46 = vmax.f32 %v376_v44, 0.0  ;;  %v391_v48 = vadd.f32 %v1007_v45, %v780_v16 }
 0x225   :  { %v385_v50 = vpop.f32.mrf.mxu1 }
 0x226   :  { %v386_v52 = vadd.f32 %v780_v16, %v385_v50  ;;  %1058 = vmatprep.mubr.f32.mxu1 %v422_v46  ;;  %v425_v58 = vmax.f32 %v391_v48, 0.0 }
 0x227   :  { %v1010_v54 = vpop.f32.mrf.mxu1  ;;  %1059 = vmatmul.mubr.f32.gmra.mxu1 %v423_v47 }
 0x228   :  { %v424_v56 = vmax.f32 %v386_v52, 0.0  ;;  %v401_v60 = vadd.f32 %v1010_v54, %v780_v16 }
 0x229   :  { %v395_v62 = vpop.f32.mrf.mxu1 }
 0x22a   :  { %v396_v0 = vadd.f32 %v780_v16, %v395_v62  ;;  %1061 = vmatprep.mubr.f32.mxu1 %v424_v56  ;;  %v427_v6 = vmax.f32 %v401_v60, 0.0 }
 0x22b   :  { %v1013_v2 = vpop.f32.mrf.mxu1  ;;  %1062 = vmatmul.mubr.f32.gmra.mxu1 %v425_v58 }
 0x22c   :  { %v426_v4 = vmax.f32 %v396_v0, 0.0  ;;  %v411_v8 = vadd.f32 %v1013_v2, %v780_v16 }
 0x22d   :  { %v405_v12 = vpop.f32.mrf.mxu1 }
 0x22e   :  { %v406_v13 = vadd.f32 %v780_v16, %v405_v12  ;;  %1064 = vmatprep.mubr.f32.mxu1 %v426_v4  ;;  %v429_v15 = vmax.f32 %v411_v8, 0.0 }
 0x22f   :  { %1065 = vmatmul.mubr.f32.gmra.mxu1 %v427_v6 }
 0x230   :  { %v428_v14 = vmax.f32 %v406_v13, 0.0 }
 0x232   :  { %1067 = vmatprep.mubr.f32.mxu1 %v428_v14 }
 0x233   :  { %1068 = vmatmul.mubr.f32.gmra.mxu1 %v429_v15 }
 0x234   :  { %1114 = vmatprep.mubr.f32.mxu1 %v1469_v63 }
 0x2d7   :  { %v1525_v17 = vpop.f32.mrf.mxu1 }
 0x2d9   :  { %v1527_v18 = vpop.f32.mrf.mxu1 }
 0x2db   :  { %v1529_v19 = vpop.f32.mrf.mxu1 }
 0x2dd   :  { %v1531_v20 = vpop.f32.mrf.mxu1 }
 0x2df   :  { %v1054_v21 = vpop.f32.mrf.mxu1 }
 0x2e1   :  { %v532_v22 = vpop.f32.mrf.mxu1 }
 0x2e3   :  { %v1057_v23 = vpop.f32.mrf.mxu1 }
 0x2e5   :  { %v542_v16 = vpop.f32.mrf.mxu1 }
 0x2e7   :  { %v1060_v24 = vpop.f32.mrf.mxu1 }
 0x2e9   :  { %v552_v25 = vpop.f32.mrf.mxu1 }
 0x2eb   :  { %v1063_v26 = vpop.f32.mrf.mxu1 }
 0x2ed   :  { %v562_v27 = vpop.f32.mrf.mxu1 }
 0x2ef   :  { %v1066_v28 = vpop.f32.mrf.mxu1 }
 0x2f1   :  { %v572_v29 = vpop.f32.mrf.mxu1 }
 0x2f3   :  { %v1069_v30 = vpop.f32.mrf.mxu1 }
 0x2f4   :  { %1070 = vmatprep.subr.mxu0 %v1069_v30  ;;  %1126 = vmatprep.subr.mxu1 %v1069_v30 }
 0x2f5   :  { %v582_v63 = vpop.f32.mrf.mxu1  ;;  %1071 = vmatpush3.msra.mxu0 %v1069_v30  ;;  %1142 = vmatpush3.msra.mxu1 %v1069_v30 }
 0x2f6   :  { %1072 = vmatprep.subr.mxu0 %v582_v63  ;;  %1127 = vmatprep.subr.mxu1 %v582_v63 }
 0x2f7   :  { %1073 = vmatpush3.msra.mxu0 %v582_v63  ;;  %1143 = vmatpush3.msra.mxu1 %v582_v63 }
 0x2f8   :  { %1074 = vmatprep.subr.mxu0 %v1066_v28  ;;  %1128 = vmatprep.subr.mxu1 %v1066_v28 }
 0x2f9   :  { %1075 = vmatpush3.msra.mxu0 %v1066_v28  ;;  %1144 = vmatpush3.msra.mxu1 %v1066_v28 }
 0x2fa   :  { %1076 = vmatprep.subr.mxu0 %v572_v29  ;;  %1129 = vmatprep.subr.mxu1 %v572_v29 }
 0x2fb   :  { %1077 = vmatpush3.msra.mxu0 %v572_v29  ;;  %1145 = vmatpush3.msra.mxu1 %v572_v29 }
 0x2fc   :  { %1078 = vmatprep.subr.mxu0 %v1063_v26  ;;  %1130 = vmatprep.subr.mxu1 %v1063_v26 }
 0x2fd   :  { %1079 = vmatpush3.msra.mxu0 %v1063_v26  ;;  %1146 = vmatpush3.msra.mxu1 %v1063_v26 }
 0x2fe   :  { %1080 = vmatprep.subr.mxu0 %v562_v27  ;;  %1131 = vmatprep.subr.mxu1 %v562_v27 }
 0x2ff   :  { %1081 = vmatpush3.msra.mxu0 %v562_v27  ;;  %1147 = vmatpush3.msra.mxu1 %v562_v27 }
 0x300   :  { %1082 = vmatprep.subr.mxu0 %v1060_v24  ;;  %1132 = vmatprep.subr.mxu1 %v1060_v24 }
 0x301   :  { %1083 = vmatpush3.msra.mxu0 %v1060_v24  ;;  %1148 = vmatpush3.msra.mxu1 %v1060_v24 }
 0x302   :  { %1084 = vmatprep.subr.mxu0 %v552_v25  ;;  %1133 = vmatprep.subr.mxu1 %v552_v25 }
 0x303   :  { %1085 = vmatpush3.msra.mxu0 %v552_v25  ;;  %1149 = vmatpush3.msra.mxu1 %v552_v25 }
 0x304   :  { %1086 = vmatprep.subr.mxu0 %v1057_v23  ;;  %1134 = vmatprep.subr.mxu1 %v1057_v23 }
 0x305   :  { %1087 = vmatpush3.msra.mxu0 %v1057_v23  ;;  %1150 = vmatpush3.msra.mxu1 %v1057_v23 }
 0x306   :  { %1088 = vmatprep.subr.mxu0 %v542_v16  ;;  %1135 = vmatprep.subr.mxu1 %v542_v16 }
 0x307   :  { %1089 = vmatpush3.msra.mxu0 %v542_v16  ;;  %1151 = vmatpush3.msra.mxu1 %v542_v16 }
 0x308   :  { %1090 = vmatprep.subr.mxu0 %v1054_v21  ;;  %1136 = vmatprep.subr.mxu1 %v1054_v21 }
 0x309   :  { %1091 = vmatpush3.msra.mxu0 %v1054_v21  ;;  %1152 = vmatpush3.msra.mxu1 %v1054_v21 }
 0x30a   :  { %1092 = vmatprep.subr.mxu0 %v532_v22  ;;  %1137 = vmatprep.subr.mxu1 %v532_v22 }
 0x30b   :  { %1093 = vmatpush3.msra.mxu0 %v532_v22  ;;  %1153 = vmatpush3.msra.mxu1 %v532_v22 }
 0x30c   :  { %1094 = vmatprep.subr.mxu0 %v1529_v19  ;;  %1138 = vmatprep.subr.mxu1 %v1529_v19 }
 0x30d   :  { %1095 = vmatpush3.msra.mxu0 %v1529_v19  ;;  %1154 = vmatpush3.msra.mxu1 %v1529_v19 }
 0x30e   :  { %1096 = vmatprep.subr.mxu0 %v1531_v20  ;;  %1139 = vmatprep.subr.mxu1 %v1531_v20 }
 0x30f   :  { %1097 = vmatpush3.msra.mxu0 %v1531_v20  ;;  %1155 = vmatpush3.msra.mxu1 %v1531_v20 }
 0x310   :  { %1098 = vmatprep.subr.mxu0 %v1525_v17  ;;  %1140 = vmatprep.subr.mxu1 %v1525_v17 }
 0x311   :  { %1099 = vmatpush3.msra.mxu0 %v1525_v17  ;;  %1156 = vmatpush3.msra.mxu1 %v1525_v17 }
 0x312   :  { %1100 = vmatprep.subr.mxu0 %v1527_v18  ;;  %1141 = vmatprep.subr.mxu1 %v1527_v18 }
 0x313   :  { %1101 = vmatpush3.msra.mxu0 %v1527_v18  ;;  %1157 = vmatpush3.msra.mxu1 %v1527_v18 }
 0x314   :  { %1103 = vmatmul.mubr.f32.vlgmr.msra.gmra.mxu0 %v1426_v49  ;;  %1115 = vmatmul.mubr.f32.vlgmr.msra.gmra.mxu1 %v1476_v1  ;;  %v781_v49 = vld [vmem:[%s1619_s5] ss:$0 sm:$0xff] }
 0x315   :  { %1105 = vmatprep.mubr.f32.mxu0 %v1432_v51  ;;  %1117 = vmatprep.mubr.f32.mxu1 %v1481_v3 }
 0x318   :  { %1106 = vmatmul.mubr.f32.gmra.mxu0 %v1440_v53  ;;  %1118 = vmatmul.mubr.f32.gmra.mxu1 %v1488_v5 }
 0x319   :  { %1108 = vmatprep.mubr.f32.mxu0 %v1445_v55  ;;  %1120 = vmatprep.mubr.f32.mxu1 %v1493_v7 }
 0x31c   :  { %1109 = vmatmul.mubr.f32.gmra.mxu0 %v1452_v57  ;;  %1121 = vmatmul.mubr.f32.gmra.mxu1 %v1500_v9 }
 0x31d   :  { %1111 = vmatprep.mubr.f32.mxu0 %v1457_v59  ;;  %1123 = vmatprep.mubr.f32.mxu1 %v1502_v10 }
 0x320   :  { %1112 = vmatmul.mubr.f32.gmra.mxu0 %v1464_v61  ;;  %1124 = vmatmul.mubr.f32.gmra.mxu1 %v1506_v11 }
 0x3d4   :  { %v1104_v51 = vpop.f32.mrf.mxu0  ;;  %v1116_v53 = vpop.f32.mrf.mxu1 }
 0x3d5   :  { %v670_v55 = vadd.f32 %v1104_v51, %v781_v49  ;;  %v710_v1 = vadd.f32 %v1116_v53, %v781_v49 }
 0x3d6   :  { %v664_v3 = vpop.f32.mrf.mxu0  ;;  %v704_v57 = vpop.f32.mrf.mxu1 }
 0x3d7   :  { %v744_v5 = vmax.f32 %v670_v55, 0.0  ;;  %v752_v7 = vmax.f32 %v710_v1, 0.0  ;;  %v665_v9 = vadd.f32 %v781_v49, %v664_v3  ;;  %v705_v59 = vadd.f32 %v781_v49, %v704_v57 }
 0x3d8   :  { %v1107_v31 = vpop.f32.mrf.mxu0  ;;  %v1119_v10 = vpop.f32.mrf.mxu1 }
 0x3d9   :  { %760 = vst [vmem:[%s1620_s6 + $0x8] sm:$0xff] %v744_v5  ;;  %768 = vst [vmem:[%s1620_s6 + $0x48] sm:$0xff] %v752_v7  ;;  %v743_v61 = vmax.f32 %v665_v9, 0.0  ;;  %v751_v11 = vmax.f32 %v705_v59, 0.0  ;;  %v680_v32 = vadd.f32 %v1107_v31, %v781_v49  ;;  %v720_v33 = vadd.f32 %v1119_v10, %v781_v49 }
 0x3da   :  { %v674_v34 = vpop.f32.mrf.mxu0  ;;  %v714_v35 = vpop.f32.mrf.mxu1 }
 0x3db   :  { %759 = vst [vmem:[%s1620_s6] sm:$0xff] %v743_v61  ;;  %767 = vst [vmem:[%s1620_s6 + $0x40] sm:$0xff] %v751_v11  ;;  %v746_v36 = vmax.f32 %v680_v32, 0.0  ;;  %v754_v37 = vmax.f32 %v720_v33, 0.0  ;;  %v675_v38 = vadd.f32 %v781_v49, %v674_v34  ;;  %v715_v39 = vadd.f32 %v781_v49, %v714_v35 }
 0x3dc   :  { %v1110_v40 = vpop.f32.mrf.mxu0  ;;  %v1122_v41 = vpop.f32.mrf.mxu1 }
 0x3dd   :  { %762 = vst [vmem:[%s1620_s6 + $0x18] sm:$0xff] %v746_v36  ;;  %770 = vst [vmem:[%s1620_s6 + $0x58] sm:$0xff] %v754_v37  ;;  %v745_v42 = vmax.f32 %v675_v38, 0.0  ;;  %v753_v43 = vmax.f32 %v715_v39, 0.0  ;;  %v690_v44 = vadd.f32 %v1110_v40, %v781_v49  ;;  %v730_v45 = vadd.f32 %v1122_v41, %v781_v49 }
 0x3de   :  { %v684_v46 = vpop.f32.mrf.mxu0  ;;  %v724_v47 = vpop.f32.mrf.mxu1 }
 0x3df   :  { %761 = vst [vmem:[%s1620_s6 + $0x10] sm:$0xff] %v745_v42  ;;  %769 = vst [vmem:[%s1620_s6 + $0x50] sm:$0xff] %v753_v43  ;;  %v748_v48 = vmax.f32 %v690_v44, 0.0  ;;  %v756_v50 = vmax.f32 %v730_v45, 0.0  ;;  %v685_v52 = vadd.f32 %v781_v49, %v684_v46  ;;  %v725_v54 = vadd.f32 %v781_v49, %v724_v47 }
 0x3e0   :  { %v1113_v56 = vpop.f32.mrf.mxu0  ;;  %v1125_v58 = vpop.f32.mrf.mxu1 }
 0x3e1   :  { %764 = vst [vmem:[%s1620_s6 + $0x28] sm:$0xff] %v748_v48  ;;  %772 = vst [vmem:[%s1620_s6 + $0x68] sm:$0xff] %v756_v50  ;;  %v747_v60 = vmax.f32 %v685_v52, 0.0  ;;  %v755_v62 = vmax.f32 %v725_v54, 0.0  ;;  %v700_v0 = vadd.f32 %v1113_v56, %v781_v49  ;;  %v740_v2 = vadd.f32 %v1125_v58, %v781_v49 }
 0x3e2   :  { %v694_v4 = vpop.f32.mrf.mxu0  ;;  %v734_v6 = vpop.f32.mrf.mxu1 }
 0x3e3   :  { %763 = vst [vmem:[%s1620_s6 + $0x20] sm:$0xff] %v747_v60  ;;  %771 = vst [vmem:[%s1620_s6 + $0x60] sm:$0xff] %v755_v62  ;;  %v750_v8 = vmax.f32 %v700_v0, 0.0  ;;  %v758_v12 = vmax.f32 %v740_v2, 0.0  ;;  %v695_v13 = vadd.f32 %v781_v49, %v694_v4  ;;  %v735_v14 = vadd.f32 %v781_v49, %v734_v6 }
 0x3e5   :  { %766 = vst [vmem:[%s1620_s6 + $0x38] sm:$0xff] %v750_v8  ;;  %774 = vst [vmem:[%s1620_s6 + $0x78] sm:$0xff] %v758_v12  ;;  %v749_v15 = vmax.f32 %v695_v13, 0.0  ;;  %v757_v17 = vmax.f32 %v735_v14, 0.0 }
 0x3e7   :  { %765 = vst [vmem:[%s1620_s6 + $0x30] sm:$0xff] %v749_v15  ;;  %773 = vst [vmem:[%s1620_s6 + $0x70] sm:$0xff] %v757_v17 }
 0x3e8   :  { %779 = vsyncpa [#allocation3], 1 }

</bundles_post_ra>
